<compile_context>
chip_gen: v5e
topology: v5e:2x2
jax: 0.10.0
libtpu: 0.0.40
codegen_flags: <defaults>
</compile_context>

<pallas_src>
from functools import partial

import jax
import jax.numpy as jnp
from jax.experimental import pallas as pl
from jax.experimental.pallas import tpu as pltpu


# ----------------------------------------------------------------------------
# Fused kernel: per-batch  QKV-projection + causal attention + wo projection
# ----------------------------------------------------------------------------
def _self_attention_kernel(q_ref, k_ref, v_ref,
                           wqkv_ref, bqkv_ref, wo_ref, bo_ref,
                           attn_ref, o_ref, *, n_heads, head_dim):
    D = n_heads * head_dim
    L = q_ref.shape[1]

    # Fused Q/K/V projection: one (L, 3D) @ (3D, 3D) matmul against a
    # block-diagonal weight (per-head weights replicated on the diagonal,
    # 1/sqrt(head_dim) already folded into the q block on the host).
    x = jnp.concatenate([q_ref[0], k_ref[0], v_ref[0]], axis=-1)      # (L, 3D)
    proj = jnp.dot(x, wqkv_ref[...],
                   preferred_element_type=jnp.float32) + bqkv_ref[0]  # (L, 3D)
    qp = proj[:, 0 * D:1 * D]   # (L, D), already scaled
    kp = proj[:, 1 * D:2 * D]
    vp = proj[:, 2 * D:3 * D]

    # Causal mask, hoisted out of the head loop (single iota pair).
    row = jax.lax.broadcasted_iota(jnp.int32, (L, L), 0)
    col = jax.lax.broadcasted_iota(jnp.int32, (L, L), 1)
    causal = col <= row

    # Small unrolled head loop (n_heads tiny, everything lives in a few vregs).
    head_outs = []
    for h in range(n_heads):
        sl = slice(h * head_dim, (h + 1) * head_dim)
        qs, ks, vs = qp[:, sl], kp[:, sl], vp[:, sl]          # (L, hd) each

        # q @ k^T without materializing a transpose of k.
        s = jax.lax.dot_general(qs, ks, (((1,), (1,)), ((), ())),
                                preferred_element_type=jnp.float32)   # (L, L)

        # Reproduce torch.tril(...) + masked_fill(==0, -inf) semantics in a
        # single select pass: drop upper triangle AND exact-zero scores.
        s = jnp.where(causal & (s != 0.0), s, -jnp.inf)

        # softmax; normalization via EUP reciprocal (free VLIW slot).
        m = jnp.max(s, axis=-1, keepdims=True)
        e = jnp.exp(s - m)
        a = e * pl.reciprocal(jnp.sum(e, axis=-1, keepdims=True), approx=True)

        attn_ref[0, h] = a
        head_outs.append(jnp.dot(a, vs, preferred_element_type=jnp.float32))

    # Merge heads back to (L, D) and apply the fused output projection.
    o = jnp.concatenate(head_outs, axis=-1)                           # (L, D)
    o_ref[0] = (jnp.dot(o, wo_ref[...], preferred_element_type=jnp.float32)
                + bo_ref[0])


# ----------------------------------------------------------------------------
# Wrapper: host-side weight packing + single pallas_call
# ----------------------------------------------------------------------------
def self_attention_forward(q, k, v, params, n_heads):
    bs, L, d_model = q.shape
    head_dim = d_model // n_heads
    scale = 1.0 / (head_dim ** 0.5)

    # Per-head (hd, hd) weight -> block-diagonal (D, D) so the projection can
    # be applied directly on the (L, D) layout without any head transpose.
    eye = jnp.eye(n_heads, dtype=jnp.float32)
    wq_bd = jnp.kron(eye, params["wq"]) * scale       # scale folded into q
    wk_bd = jnp.kron(eye, params["wk"])
    wv_bd = jnp.kron(eye, params["wv"])

    D3 = 3 * d_model
    wqkv = jnp.zeros((D3, D3), jnp.float32)
    wqkv = wqkv.at[0 * d_model:1 * d_model, 0 * d_model:1 * d_model].set(wq_bd)
    wqkv = wqkv.at[1 * d_model:2 * d_model, 1 * d_model:2 * d_model].set(wk_bd)
    wqkv = wqkv.at[2 * d_model:3 * d_model, 2 * d_model:3 * d_model].set(wv_bd)

    bq = jnp.tile(params["bq"].reshape(-1), n_heads) * scale
    bk = jnp.tile(params["bk"].reshape(-1), n_heads)
    bv = jnp.tile(params["bv"].reshape(-1), n_heads)
    bqkv = jnp.concatenate([bq, bk, bv]).reshape(1, D3)

    x_spec = pl.BlockSpec((1, L, d_model), lambda b: (b, 0, 0))

    attn_w, o = pl.pallas_call(
        partial(_self_attention_kernel, n_heads=n_heads, head_dim=head_dim),
        grid=(bs,),
        in_specs=[x_spec, x_spec, x_spec,
                  pl.BlockSpec((D3, D3), lambda b: (0, 0)),
                  pl.BlockSpec((1, D3), lambda b: (0, 0)),
                  pl.BlockSpec((d_model, d_model), lambda b: (0, 0)),
                  pl.BlockSpec((1, d_model), lambda b: (0, 0))],
        out_specs=[pl.BlockSpec((1, n_heads, L, L), lambda b: (b, 0, 0, 0)),
                   pl.BlockSpec((1, L, d_model), lambda b: (b, 0, 0))],
        out_shape=(jax.ShapeDtypeStruct((bs, n_heads, L, L), jnp.float32),
                   jax.ShapeDtypeStruct((bs, L, d_model), jnp.float32)),
        compiler_params=pltpu.CompilerParams(
            dimension_semantics=("parallel",)),
    )(q, k, v, wqkv, bqkv, params["wo"], params["bo"])

    return attn_w, o


# ----------------------------------------------------------------------------
# Pure-JAX reference (mirrors the PyTorch forward) for sanity check
# ----------------------------------------------------------------------------
def _reference(q, k, v, params, n_heads):
    bs, L, d_model = q.shape
    hd = d_model // n_heads
    sh = lambda x: x.reshape(bs, L, n_heads, hd).transpose(0, 2, 1, 3)
    qh, kh, vh = sh(q), sh(k), sh(v)
    qp = qh @ params["wq"] + params["bq"][0]
    kp = kh @ params["wk"] + params["bk"][0]
    vp = vh @ params["wv"] + params["bv"][0]
    s = qp @ kp.transpose(0, 1, 3, 2) / (hd ** 0.5)
    tril = jnp.tril(jnp.ones((L, L), bool))
    s = jnp.where(tril, s, 0.0)
    s = jnp.where(s == 0.0, -jnp.inf, s)
    a = jax.nn.softmax(s, axis=-1)
    o = (a @ vp).transpose(0, 2, 1, 3).reshape(bs, L, d_model)
    o = o @ params["wo"] + params["bo"][0]
    return a, o


if __name__ == "__main__":
    d_model, n_heads = 32, 4
    head_dim = d_model // n_heads
    bs, seq_len = 2, 8   # seq <= max_len (64)

    key = jax.random.PRNGKey(0)
    ks = jax.random.split(key, 11)

    # Deterministic nn.Linear-style init; weights stored pre-transposed as
    # (in_features, out_features) so everything is x @ W + b.
    def lin(kw, kb, fan_in, fan_out):
        bound = 1.0 / (fan_in ** 0.5)
        w = jax.random.uniform(kw, (fan_in, fan_out), jnp.float32, -bound, bound)
        b = jax.random.uniform(kb, (1, fan_out), jnp.float32, -bound, bound)
        return w, b

    wq, bq = lin(ks[0], ks[1], head_dim, head_dim)
    wk, bk = lin(ks[2], ks[3], head_dim, head_dim)
    wv, bv = lin(ks[4], ks[5], head_dim, head_dim)
    wo, bo = lin(ks[6], ks[7], d_model, d_model)
    params = dict(wq=wq, bq=bq, wk=wk, bk=bk, wv=wv, bv=bv, wo=wo, bo=bo)

    q = jax.random.normal(ks[8], (bs, seq_len, d_model), jnp.float32)
    k = jax.random.normal(ks[9], (bs, seq_len, d_model), jnp.float32)
    v = jax.random.normal(ks[10], (bs, seq_len, d_model), jnp.float32)

    attn_w, out = self_attention_forward(q, k, v, params, n_heads)
    jax.block_until_ready((attn_w, out))

    ref_attn, ref_out = _reference(q, k, v, params, n_heads)
    assert attn_w.shape == (bs, n_heads, seq_len, seq_len)
    assert out.shape == (bs, seq_len, d_model)
    assert jnp.allclose(attn_w, ref_attn, atol=1e-2, rtol=1e-2)
    assert jnp.allclose(out, ref_out, atol=1e-2, rtol=1e-2)

    print("KERNEL_OK")
</pallas_src>

<mosaic_0001>
module attributes {stable_mosaic.version = 11 : i64} {
  func.func @_self_attention_kernel(%arg0: i32, %arg1: memref<1x8x32xf32, #tpu.memory_space<vmem>>, %arg2: memref<1x8x32xf32, #tpu.memory_space<vmem>>, %arg3: memref<1x8x32xf32, #tpu.memory_space<vmem>>, %arg4: memref<96x96xf32, #tpu.memory_space<vmem>>, %arg5: memref<1x96xf32, #tpu.memory_space<vmem>>, %arg6: memref<32x32xf32, #tpu.memory_space<vmem>>, %arg7: memref<1x32xf32, #tpu.memory_space<vmem>>, %arg8: memref<1x4x8x8xf32, #tpu.memory_space<vmem>>, %arg9: memref<1x8x32xf32, #tpu.memory_space<vmem>>) attributes {dimension_semantics = [#tpu.dimension_semantics<parallel>], iteration_bounds = array<i64: 2>, scalar_prefetch = 0 : i64, scratch_operands = 0 : i64, tpu.core_type = #tpu.core_type<tc>, window_params = [{transform_indices = @transform_0, window_bounds = array<i64: 1, 8, 32>}, {transform_indices = @transform_1, window_bounds = array<i64: 1, 8, 32>}, {transform_indices = @transform_2, window_bounds = array<i64: 1, 8, 32>}, {pipeline_mode = #tpu.pipeline_mode<synchronous>, transform_indices = @transform_3, window_bounds = array<i64: 96, 96>}, {pipeline_mode = #tpu.pipeline_mode<synchronous>, transform_indices = @transform_4, window_bounds = array<i64: 1, 96>}, {pipeline_mode = #tpu.pipeline_mode<synchronous>, transform_indices = @transform_5, window_bounds = array<i64: 32, 32>}, {pipeline_mode = #tpu.pipeline_mode<synchronous>, transform_indices = @transform_6, window_bounds = array<i64: 1, 32>}, {transform_indices = @transform_7, window_bounds = array<i64: 1, 4, 8, 8>}, {transform_indices = @transform_8, window_bounds = array<i64: 1, 8, 32>}]} {
    %c0 = arith.constant 0 : index
    %c0_0 = arith.constant 0 : index
    %c0_1 = arith.constant 0 : index
    %0 = vector.load %arg1[%c0, %c0_0, %c0_1] : memref<1x8x32xf32, #tpu.memory_space<vmem>>, vector<1x8x32xf32>
    %1 = vector.shape_cast %0 : vector<1x8x32xf32> to vector<8x32xf32>
    %c0_2 = arith.constant 0 : index
    %c0_3 = arith.constant 0 : index
    %c0_4 = arith.constant 0 : index
    %2 = vector.load %arg2[%c0_2, %c0_3, %c0_4] : memref<1x8x32xf32, #tpu.memory_space<vmem>>, vector<1x8x32xf32>
    %3 = vector.shape_cast %2 : vector<1x8x32xf32> to vector<8x32xf32>
    %c0_5 = arith.constant 0 : index
    %c0_6 = arith.constant 0 : index
    %c0_7 = arith.constant 0 : index
    %4 = vector.load %arg3[%c0_5, %c0_6, %c0_7] : memref<1x8x32xf32, #tpu.memory_space<vmem>>, vector<1x8x32xf32>
    %5 = vector.shape_cast %4 : vector<1x8x32xf32> to vector<8x32xf32>
    %6 = tpu.concatenate %1, %3, %5 in 1 : vector<8x32xf32>, vector<8x32xf32>, vector<8x32xf32> -> vector<8x96xf32>
    %c0_8 = arith.constant 0 : index
    %c0_9 = arith.constant 0 : index
    %7 = vector.load %arg4[%c0_8, %c0_9] : memref<96x96xf32, #tpu.memory_space<vmem>>, vector<96x96xf32>
    %cst = arith.constant dense<0.000000e+00> : vector<8x96xf32>
    %8 = tpu.matmul %6, %7, %cst {dimension_numbers = #tpu.dot_dimension_numbers<[1], [0], [0], [1], [0, 0, 1, 1], [], []>} : vector<8x96xf32>, vector<96x96xf32>, vector<8x96xf32> -> vector<8x96xf32>
    %c0_10 = arith.constant 0 : index
    %c0_11 = arith.constant 0 : index
    %9 = vector.load %arg5[%c0_10, %c0_11] : memref<1x96xf32, #tpu.memory_space<vmem>>, vector<1x96xf32>
    %10 = vector.shape_cast %9 : vector<1x96xf32> to vector<96xf32>
    %11 = vector.shape_cast %10 : vector<96xf32> to vector<1x96xf32>
    %12 = vector.broadcast %11 : vector<1x96xf32> to vector<8x96xf32>
    %13 = arith.addf %8, %12 : vector<8x96xf32>
    %14 = vector.extract_strided_slice %13 {offsets = [0, 0], sizes = [8, 32], strides = [1, 1]} : vector<8x96xf32> to vector<8x32xf32>
    %15 = vector.extract_strided_slice %13 {offsets = [0, 32], sizes = [8, 32], strides = [1, 1]} : vector<8x96xf32> to vector<8x32xf32>
    %16 = vector.extract_strided_slice %13 {offsets = [0, 64], sizes = [8, 32], strides = [1, 1]} : vector<8x96xf32> to vector<8x32xf32>
    %17 = tpu.iota {dimensions = array<i32: 0>} : vector<8x8xi32>
    %18 = tpu.iota {dimensions = array<i32: 1>} : vector<8x8xi32>
    %19 = arith.cmpi sle, %18, %17 : vector<8x8xi32>
    %20 = vector.extract_strided_slice %14 {offsets = [0, 0], sizes = [8, 8], strides = [1, 1]} : vector<8x32xf32> to vector<8x8xf32>
    %21 = vector.extract_strided_slice %15 {offsets = [0, 0], sizes = [8, 8], strides = [1, 1]} : vector<8x32xf32> to vector<8x8xf32>
    %22 = vector.extract_strided_slice %16 {offsets = [0, 0], sizes = [8, 8], strides = [1, 1]} : vector<8x32xf32> to vector<8x8xf32>
    %cst_12 = arith.constant dense<0.000000e+00> : vector<8x8xf32>
    %23 = tpu.matmul %20, %21, %cst_12 {dimension_numbers = #tpu.dot_dimension_numbers<[1], [1], [0], [0], [0, 0, 1, 0], [], []>} : vector<8x8xf32>, vector<8x8xf32>, vector<8x8xf32> -> vector<8x8xf32>
    %cst_13 = arith.constant 0.000000e+00 : f32
    %24 = vector.broadcast %cst_13 : f32 to vector<8x8xf32>
    %25 = arith.cmpf one, %23, %24 : vector<8x8xf32>
    %26 = arith.andi %19, %25 : vector<8x8xi1>
    %cst_14 = arith.constant 0xFF800000 : f32
    %27 = vector.broadcast %cst_14 : f32 to vector<8x8xf32>
    %28 = arith.select %26, %23, %27 : vector<8x8xi1>, vector<8x8xf32>
    %cst_15 = arith.constant dense<0xFF800000> : vector<8xf32>
    %29 = vector.multi_reduction <maximumf>, %28, %cst_15 [1] : vector<8x8xf32> to vector<8xf32>
    %30 = vector.shape_cast %29 : vector<8xf32> to vector<8x1xf32>
    %31 = vector.broadcast %30 : vector<8x1xf32> to vector<8x8xf32>
    %32 = arith.subf %28, %31 : vector<8x8xf32>
    %33 = math.exp %32 : vector<8x8xf32>
    %cst_16 = arith.constant dense<0.000000e+00> : vector<8xf32>
    %34 = vector.multi_reduction <add>, %33, %cst_16 [1] : vector<8x8xf32> to vector<8xf32>
    %35 = vector.shape_cast %34 : vector<8xf32> to vector<8x1xf32>
    %36 = tpu.reciprocal %35 {approx = true} : vector<8x1xf32> -> vector<8x1xf32>
    %37 = vector.broadcast %36 : vector<8x1xf32> to vector<8x8xf32>
    %38 = arith.mulf %33, %37 : vector<8x8xf32>
    %c0_17 = arith.constant 0 : index
    %c0_18 = arith.constant 0 : index
    %c0_19 = arith.constant 0 : index
    %c0_20 = arith.constant 0 : index
    %39 = vector.load %arg8[%c0_17, %c0_18, %c0_19, %c0_20] : memref<1x4x8x8xf32, #tpu.memory_space<vmem>>, vector<1x1x8x8xf32>
    %40 = vector.shape_cast %39 : vector<1x1x8x8xf32> to vector<8x8xf32>
    %41 = vector.shape_cast %38 : vector<8x8xf32> to vector<1x1x8x8xf32>
    tpu.vector_store %arg8[%c0_17, %c0_18, %c0_19, %c0_20], %41 {strides = array<i32>} : memref<1x4x8x8xf32, #tpu.memory_space<vmem>>, vector<1x1x8x8xf32>,
    %cst_21 = arith.constant dense<0.000000e+00> : vector<8x8xf32>
    %42 = tpu.matmul %38, %22, %cst_21 {dimension_numbers = #tpu.dot_dimension_numbers<[1], [0], [0], [1], [0, 0, 1, 1], [], []>} : vector<8x8xf32>, vector<8x8xf32>, vector<8x8xf32> -> vector<8x8xf32>
    %43 = vector.extract_strided_slice %14 {offsets = [0, 8], sizes = [8, 8], strides = [1, 1]} : vector<8x32xf32> to vector<8x8xf32>
    %44 = vector.extract_strided_slice %15 {offsets = [0, 8], sizes = [8, 8], strides = [1, 1]} : vector<8x32xf32> to vector<8x8xf32>
    %45 = vector.extract_strided_slice %16 {offsets = [0, 8], sizes = [8, 8], strides = [1, 1]} : vector<8x32xf32> to vector<8x8xf32>
    %cst_22 = arith.constant dense<0.000000e+00> : vector<8x8xf32>
    %46 = tpu.matmul %43, %44, %cst_22 {dimension_numbers = #tpu.dot_dimension_numbers<[1], [1], [0], [0], [0, 0, 1, 0], [], []>} : vector<8x8xf32>, vector<8x8xf32>, vector<8x8xf32> -> vector<8x8xf32>
    %cst_23 = arith.constant 0.000000e+00 : f32
    %47 = vector.broadcast %cst_23 : f32 to vector<8x8xf32>
    %48 = arith.cmpf one, %46, %47 : vector<8x8xf32>
    %49 = arith.andi %19, %48 : vector<8x8xi1>
    %cst_24 = arith.constant 0xFF800000 : f32
    %50 = vector.broadcast %cst_24 : f32 to vector<8x8xf32>
    %51 = arith.select %49, %46, %50 : vector<8x8xi1>, vector<8x8xf32>
    %cst_25 = arith.constant dense<0xFF800000> : vector<8xf32>
    %52 = vector.multi_reduction <maximumf>, %51, %cst_25 [1] : vector<8x8xf32> to vector<8xf32>
    %53 = vector.shape_cast %52 : vector<8xf32> to vector<8x1xf32>
    %54 = vector.broadcast %53 : vector<8x1xf32> to vector<8x8xf32>
    %55 = arith.subf %51, %54 : vector<8x8xf32>
    %56 = math.exp %55 : vector<8x8xf32>
    %cst_26 = arith.constant dense<0.000000e+00> : vector<8xf32>
    %57 = vector.multi_reduction <add>, %56, %cst_26 [1] : vector<8x8xf32> to vector<8xf32>
    %58 = vector.shape_cast %57 : vector<8xf32> to vector<8x1xf32>
    %59 = tpu.reciprocal %58 {approx = true} : vector<8x1xf32> -> vector<8x1xf32>
    %60 = vector.broadcast %59 : vector<8x1xf32> to vector<8x8xf32>
    %61 = arith.mulf %56, %60 : vector<8x8xf32>
    %c0_27 = arith.constant 0 : index
    %c1 = arith.constant 1 : index
    %c0_28 = arith.constant 0 : index
    %c0_29 = arith.constant 0 : index
    %62 = vector.load %arg8[%c0_27, %c1, %c0_28, %c0_29] : memref<1x4x8x8xf32, #tpu.memory_space<vmem>>, vector<1x1x8x8xf32>
    %63 = vector.shape_cast %62 : vector<1x1x8x8xf32> to vector<8x8xf32>
    %64 = vector.shape_cast %61 : vector<8x8xf32> to vector<1x1x8x8xf32>
    tpu.vector_store %arg8[%c0_27, %c1, %c0_28, %c0_29], %64 {strides = array<i32>} : memref<1x4x8x8xf32, #tpu.memory_space<vmem>>, vector<1x1x8x8xf32>,
    %cst_30 = arith.constant dense<0.000000e+00> : vector<8x8xf32>
    %65 = tpu.matmul %61, %45, %cst_30 {dimension_numbers = #tpu.dot_dimension_numbers<[1], [0], [0], [1], [0, 0, 1, 1], [], []>} : vector<8x8xf32>, vector<8x8xf32>, vector<8x8xf32> -> vector<8x8xf32>
    %66 = vector.extract_strided_slice %14 {offsets = [0, 16], sizes = [8, 8], strides = [1, 1]} : vector<8x32xf32> to vector<8x8xf32>
    %67 = vector.extract_strided_slice %15 {offsets = [0, 16], sizes = [8, 8], strides = [1, 1]} : vector<8x32xf32> to vector<8x8xf32>
    %68 = vector.extract_strided_slice %16 {offsets = [0, 16], sizes = [8, 8], strides = [1, 1]} : vector<8x32xf32> to vector<8x8xf32>
    %cst_31 = arith.constant dense<0.000000e+00> : vector<8x8xf32>
    %69 = tpu.matmul %66, %67, %cst_31 {dimension_numbers = #tpu.dot_dimension_numbers<[1], [1], [0], [0], [0, 0, 1, 0], [], []>} : vector<8x8xf32>, vector<8x8xf32>, vector<8x8xf32> -> vector<8x8xf32>
    %cst_32 = arith.constant 0.000000e+00 : f32
    %70 = vector.broadcast %cst_32 : f32 to vector<8x8xf32>
    %71 = arith.cmpf one, %69, %70 : vector<8x8xf32>
    %72 = arith.andi %19, %71 : vector<8x8xi1>
    %cst_33 = arith.constant 0xFF800000 : f32
    %73 = vector.broadcast %cst_33 : f32 to vector<8x8xf32>
    %74 = arith.select %72, %69, %73 : vector<8x8xi1>, vector<8x8xf32>
    %cst_34 = arith.constant dense<0xFF800000> : vector<8xf32>
    %75 = vector.multi_reduction <maximumf>, %74, %cst_34 [1] : vector<8x8xf32> to vector<8xf32>
    %76 = vector.shape_cast %75 : vector<8xf32> to vector<8x1xf32>
    %77 = vector.broadcast %76 : vector<8x1xf32> to vector<8x8xf32>
    %78 = arith.subf %74, %77 : vector<8x8xf32>
    %79 = math.exp %78 : vector<8x8xf32>
    %cst_35 = arith.constant dense<0.000000e+00> : vector<8xf32>
    %80 = vector.multi_reduction <add>, %79, %cst_35 [1] : vector<8x8xf32> to vector<8xf32>
    %81 = vector.shape_cast %80 : vector<8xf32> to vector<8x1xf32>
    %82 = tpu.reciprocal %81 {approx = true} : vector<8x1xf32> -> vector<8x1xf32>
    %83 = vector.broadcast %82 : vector<8x1xf32> to vector<8x8xf32>
    %84 = arith.mulf %79, %83 : vector<8x8xf32>
    %c0_36 = arith.constant 0 : index
    %c2 = arith.constant 2 : index
    %c0_37 = arith.constant 0 : index
    %c0_38 = arith.constant 0 : index
    %85 = vector.load %arg8[%c0_36, %c2, %c0_37, %c0_38] : memref<1x4x8x8xf32, #tpu.memory_space<vmem>>, vector<1x1x8x8xf32>
    %86 = vector.shape_cast %85 : vector<1x1x8x8xf32> to vector<8x8xf32>
    %87 = vector.shape_cast %84 : vector<8x8xf32> to vector<1x1x8x8xf32>
    tpu.vector_store %arg8[%c0_36, %c2, %c0_37, %c0_38], %87 {strides = array<i32>} : memref<1x4x8x8xf32, #tpu.memory_space<vmem>>, vector<1x1x8x8xf32>,
    %cst_39 = arith.constant dense<0.000000e+00> : vector<8x8xf32>
    %88 = tpu.matmul %84, %68, %cst_39 {dimension_numbers = #tpu.dot_dimension_numbers<[1], [0], [0], [1], [0, 0, 1, 1], [], []>} : vector<8x8xf32>, vector<8x8xf32>, vector<8x8xf32> -> vector<8x8xf32>
    %89 = vector.extract_strided_slice %14 {offsets = [0, 24], sizes = [8, 8], strides = [1, 1]} : vector<8x32xf32> to vector<8x8xf32>
    %90 = vector.extract_strided_slice %15 {offsets = [0, 24], sizes = [8, 8], strides = [1, 1]} : vector<8x32xf32> to vector<8x8xf32>
    %91 = vector.extract_strided_slice %16 {offsets = [0, 24], sizes = [8, 8], strides = [1, 1]} : vector<8x32xf32> to vector<8x8xf32>
    %cst_40 = arith.constant dense<0.000000e+00> : vector<8x8xf32>
    %92 = tpu.matmul %89, %90, %cst_40 {dimension_numbers = #tpu.dot_dimension_numbers<[1], [1], [0], [0], [0, 0, 1, 0], [], []>} : vector<8x8xf32>, vector<8x8xf32>, vector<8x8xf32> -> vector<8x8xf32>
    %cst_41 = arith.constant 0.000000e+00 : f32
    %93 = vector.broadcast %cst_41 : f32 to vector<8x8xf32>
    %94 = arith.cmpf one, %92, %93 : vector<8x8xf32>
    %95 = arith.andi %19, %94 : vector<8x8xi1>
    %cst_42 = arith.constant 0xFF800000 : f32
    %96 = vector.broadcast %cst_42 : f32 to vector<8x8xf32>
    %97 = arith.select %95, %92, %96 : vector<8x8xi1>, vector<8x8xf32>
    %cst_43 = arith.constant dense<0xFF800000> : vector<8xf32>
    %98 = vector.multi_reduction <maximumf>, %97, %cst_43 [1] : vector<8x8xf32> to vector<8xf32>
    %99 = vector.shape_cast %98 : vector<8xf32> to vector<8x1xf32>
    %100 = vector.broadcast %99 : vector<8x1xf32> to vector<8x8xf32>
    %101 = arith.subf %97, %100 : vector<8x8xf32>
    %102 = math.exp %101 : vector<8x8xf32>
    %cst_44 = arith.constant dense<0.000000e+00> : vector<8xf32>
    %103 = vector.multi_reduction <add>, %102, %cst_44 [1] : vector<8x8xf32> to vector<8xf32>
    %104 = vector.shape_cast %103 : vector<8xf32> to vector<8x1xf32>
    %105 = tpu.reciprocal %104 {approx = true} : vector<8x1xf32> -> vector<8x1xf32>
    %106 = vector.broadcast %105 : vector<8x1xf32> to vector<8x8xf32>
    %107 = arith.mulf %102, %106 : vector<8x8xf32>
    %c0_45 = arith.constant 0 : index
    %c3 = arith.constant 3 : index
    %c0_46 = arith.constant 0 : index
    %c0_47 = arith.constant 0 : index
    %108 = vector.load %arg8[%c0_45, %c3, %c0_46, %c0_47] : memref<1x4x8x8xf32, #tpu.memory_space<vmem>>, vector<1x1x8x8xf32>
    %109 = vector.shape_cast %108 : vector<1x1x8x8xf32> to vector<8x8xf32>
    %110 = vector.shape_cast %107 : vector<8x8xf32> to vector<1x1x8x8xf32>
    tpu.vector_store %arg8[%c0_45, %c3, %c0_46, %c0_47], %110 {strides = array<i32>} : memref<1x4x8x8xf32, #tpu.memory_space<vmem>>, vector<1x1x8x8xf32>,
    %cst_48 = arith.constant dense<0.000000e+00> : vector<8x8xf32>
    %111 = tpu.matmul %107, %91, %cst_48 {dimension_numbers = #tpu.dot_dimension_numbers<[1], [0], [0], [1], [0, 0, 1, 1], [], []>} : vector<8x8xf32>, vector<8x8xf32>, vector<8x8xf32> -> vector<8x8xf32>
    %112 = tpu.concatenate %42, %65, %88, %111 in 1 : vector<8x8xf32>, vector<8x8xf32>, vector<8x8xf32>, vector<8x8xf32> -> vector<8x32xf32>
    %c0_49 = arith.constant 0 : index
    %c0_50 = arith.constant 0 : index
    %113 = vector.load %arg6[%c0_49, %c0_50] : memref<32x32xf32, #tpu.memory_space<vmem>>, vector<32x32xf32>
    %cst_51 = arith.constant dense<0.000000e+00> : vector<8x32xf32>
    %114 = tpu.matmul %112, %113, %cst_51 {dimension_numbers = #tpu.dot_dimension_numbers<[1], [0], [0], [1], [0, 0, 1, 1], [], []>} : vector<8x32xf32>, vector<32x32xf32>, vector<8x32xf32> -> vector<8x32xf32>
    %c0_52 = arith.constant 0 : index
    %c0_53 = arith.constant 0 : index
    %115 = vector.load %arg7[%c0_52, %c0_53] : memref<1x32xf32, #tpu.memory_space<vmem>>, vector<1x32xf32>
    %116 = vector.shape_cast %115 : vector<1x32xf32> to vector<32xf32>
    %117 = vector.shape_cast %116 : vector<32xf32> to vector<1x32xf32>
    %118 = vector.broadcast %117 : vector<1x32xf32> to vector<8x32xf32>
    %119 = arith.addf %114, %118 : vector<8x32xf32>
    %c0_54 = arith.constant 0 : index
    %c0_55 = arith.constant 0 : index
    %c0_56 = arith.constant 0 : index
    %120 = vector.load %arg9[%c0_54, %c0_55, %c0_56] : memref<1x8x32xf32, #tpu.memory_space<vmem>>, vector<1x8x32xf32>
    %121 = vector.shape_cast %120 : vector<1x8x32xf32> to vector<8x32xf32>
    %122 = vector.shape_cast %119 : vector<8x32xf32> to vector<1x8x32xf32>
    tpu.vector_store %arg9[%c0_54, %c0_55, %c0_56], %122 {strides = array<i32>} : memref<1x8x32xf32, #tpu.memory_space<vmem>>, vector<1x8x32xf32>,
    return
  }
  func.func @transform_0(%arg0: i32) -> (i32, i32, i32) {
    %c0_i32 = arith.constant 0 : i32
    %c0_i32_0 = arith.constant 0 : i32
    %c0_i32_1 = arith.constant 0 : i32
    return %arg0, %c0_i32, %c0_i32_0 : i32, i32, i32
  }
  func.func @transform_1(%arg0: i32) -> (i32, i32, i32) {
    %c0_i32 = arith.constant 0 : i32
    %c0_i32_0 = arith.constant 0 : i32
    %c0_i32_1 = arith.constant 0 : i32
    return %arg0, %c0_i32, %c0_i32_0 : i32, i32, i32
  }
  func.func @transform_2(%arg0: i32) -> (i32, i32, i32) {
    %c0_i32 = arith.constant 0 : i32
    %c0_i32_0 = arith.constant 0 : i32
    %c0_i32_1 = arith.constant 0 : i32
    return %arg0, %c0_i32, %c0_i32_0 : i32, i32, i32
  }
  func.func @transform_3(%arg0: i32) -> (i32, i32) {
    %c0_i32 = arith.constant 0 : i32
    %c0_i32_0 = arith.constant 0 : i32
    %c0_i32_1 = arith.constant 0 : i32
    return %c0_i32, %c0_i32_0 : i32, i32
  }
  func.func @transform_4(%arg0: i32) -> (i32, i32) {
    %c0_i32 = arith.constant 0 : i32
    %c0_i32_0 = arith.constant 0 : i32
    %c0_i32_1 = arith.constant 0 : i32
    return %c0_i32, %c0_i32_0 : i32, i32
  }
  func.func @transform_5(%arg0: i32) -> (i32, i32) {
    %c0_i32 = arith.constant 0 : i32
    %c0_i32_0 = arith.constant 0 : i32
    %c0_i32_1 = arith.constant 0 : i32
    return %c0_i32, %c0_i32_0 : i32, i32
  }
  func.func @transform_6(%arg0: i32) -> (i32, i32) {
    %c0_i32 = arith.constant 0 : i32
    %c0_i32_0 = arith.constant 0 : i32
    %c0_i32_1 = arith.constant 0 : i32
    return %c0_i32, %c0_i32_0 : i32, i32
  }
  func.func @transform_7(%arg0: i32) -> (i32, i32, i32, i32) {
    %c0_i32 = arith.constant 0 : i32
    %c0_i32_0 = arith.constant 0 : i32
    %c0_i32_1 = arith.constant 0 : i32
    %c0_i32_2 = arith.constant 0 : i32
    return %arg0, %c0_i32, %c0_i32_0, %c0_i32_1 : i32, i32, i32, i32
  }
  func.func @transform_8(%arg0: i32) -> (i32, i32, i32) {
    %c0_i32 = arith.constant 0 : i32
    %c0_i32_0 = arith.constant 0 : i32
    %c0_i32_1 = arith.constant 0 : i32
    return %arg0, %c0_i32, %c0_i32_0 : i32, i32, i32
  }
}

</mosaic_0001>

<bundles_post_ra>
// kernel: tpu_custom_call.1
= control target key start
LH: loop header
LB: loop body
LE: loop exit
PB: predicated region body
PF: predicated region fallthrough
CT: control target
= control target key end

     0   :  { %s1830_s0 = inlined_call_operand.hbm [shape: f32[2,8,32], index: 0, kind: input, shape index: {}]   ;;  %s1831_s1 = inlined_call_operand.hbm [shape: f32[2,8,32], index: 1, kind: input, shape index: {}]   ;;  %s1832_s2 = inlined_call_operand.hbm [shape: f32[2,8,32], index: 2, kind: input, shape index: {}]   ;;  %s1833_s3 = inlined_call_operand.hbm [shape: f32[96,96], index: 3, kind: input, shape index: {}]   ;;  %s1834_s4 = inlined_call_operand.vmem [shape: f32[1,96], index: 4, kind: input, shape index: {}]   ;;  %s1835_s5 = inlined_call_operand.hbm [shape: f32[32,32], index: 5, kind: input, shape index: {}]   ;;  %s1836_s6 = inlined_call_operand.vmem [shape: f32[1,32], index: 6, kind: input, shape index: {}]   ;;  %s1837_s7 = inlined_call_operand.hbm [shape: f32[2,4,8,8], index: 7, kind: output, shape index: {0}]   ;;  %s1838_s8 = inlined_call_operand.hbm [shape: f32[2,8,32], index: 8, kind: output, shape index: {1}]  }
   0x1   :  { %1848 = sst [smem:[#allocation24_spill]] %s1831_s1 }
   0x2   :  { %1849 = sst [smem:[#allocation25_spill]] %s1833_s3 }
   0x3   :  { %1850 = sst [smem:[#allocation26_spill]] %s1836_s6 }
   0x4   :  { %14 = vsyncpa [#allocation3], 0 }
   0x5   :  { %16 = vsyncpa [#allocation3 + $0x1], 0 }
   0x6   :  { %17 = vsyncpa [#allocation6], 0 }
   0x7   :  { %19 = vsyncpa [#allocation6 + $0x1], 0 }
   0x8   :  { %20 = vsyncpa [#allocation9], 0 }
   0x9   :  { %21 = vsyncpa [#allocation4], 0 }
   0xa   :  { %23 = vsyncpa [#allocation4 + $0x1], 0 }
   0xb   :  { %24 = vsyncpa [#allocation13], 0 }
   0xc   :  { %26 = vsyncpa [#allocation13 + $0x1], 0  ;;  %s1518_s27 = smov 0   ;;  %s1520_s28 = smov 0  }
   0xd   :  { %s1522_s29 = smov 0   ;;  %s1524_s30 = smov 0  }
   0xe LB: > { %1851 = sst [smem:[#allocation19_spill]] %s1439_s27  ;;  %s1542_s12 = sadd.s32 4294967295, %s1451_s30   ;;  %s1451_s30 = sphi %s1524_s30, %s1874_s30   ;;  %s1447_s29 = sphi %s1522_s29, %s1878_s29   ;;  %s1443_s28 = sphi %s1520_s28, %s1877_s28   ;;  %s1439_s27 = sphi %s1518_s27, %s1876_s27  }
   0xf   : > { %1852 = sst [smem:[#allocation20_spill]] %s1451_s30  ;;  %p1034_p0 = scmp.ge.s32.totalorder %s1451_s30, 1 }
  0x10   : > { %s1853_s3 = sld [smem:[#allocation25_spill]]  ;;  %p1847_p1 = scmp.eq.s32.totalorder %s1542_s12, 0 }
  0x11   : > { %p251_p2 = scmp.lt.s32.totalorder %s1451_s30, 3  ;;  %s1453_s14 = smov [#allocation8]  }
  0x12   : > { %s264_s15 = sshll.u32 %s1453_s14, 4  ;;  %s1839_s17 = smov 128   ;;  %s265_s15 = int_to_ptr.vmem [resolvable:$true] %s264_s15 }
  0x13   : > { %p1547_p3 = pnand %p1034_p0, %p251_p2  ;;  %s1840_s18 = smov 8  }
  0x14   : > { %s1033_s19 = sadd.s32 4294967294, %s1451_s30   ;;  %s1567_s20 = sadd.s32 1, %s1451_s30  }
  0x15   : > { %p1095_p4 = pneg %p1547_p3  ;;  %1856 = sst [smem:[#allocation21_spill]] %s1567_s20 }
  0x16   : > { %s262_s11 = sshll.u32 %s1853_s3, 4  ;;  %s39_s21 = sadd.s32 1, %s1447_s29  ;;  %s263_s11 = int_to_ptr.hbm [resolvable:$true] %s262_s11 }
  0x17   : > { %p1556_p6 = pnand %p1095_p4, %p1847_p1  ;;  %s36_s22 = ssub.s32 %s1451_s30, %s1567_s20 }
  0x18   : > { %p46_p7 = scmp.ne.s32.totalorder %s1447_s29, %s1443_s28  ;;  %p37_p8 = scmp.eq.s32.totalorder %s36_s22, 0 }
  0x19   : > { %1098 = dma.hbm_to_vmem [thread:$0]  (!%p1556_p6), %s263_s11, 1536, %s265_s15, [#allocation9], %s1839_s17, %s1839_s17, %s1840_s18  }
  0x1a   : > { %p47_p9 = scmp.eq.s32.totalorder %s1451_s30, 0  ;;  %p52_p10 = scmp.ne.s32.totalorder %s1443_s28, %s1439_s27 }
  0x1b   : > { %p212_p11 = scmp.eq.s32.totalorder %s1542_s12, 1  ;;  %p218_p2 = scmp.eq.s32.totalorder %s1033_s19, 1 }
  0x1c   : > { %s1579_s23 = scalar_select %p37_p8, %s1447_s29, %s39_s21  }
  0x1d   : > { %p48_p12 = por %p47_p9, %p46_p7  ;;  %p1583_p13 = por %p1847_p1, %p52_p10 }
  0x1e   : > { %1857 = sst [smem:[#allocation22_spill]] %s1579_s23  ;;  %p1587_p0 = por %p212_p11, %p46_p7 }
  0x1f   : > { %p1121_p4 = scmp.lt.s32.totalorder %s1451_s30, 2  ;;  %s1841_s26 = sand.u32 1, %s1447_s29  }
  0x20   : > { %p1593_p5 = por %p218_p2, %p52_p10  ;;  %s1599_s10 = sshll.u32 %s1841_s26, 3 }
  0x21   : > { %s1602_s11 = sshll.u32 %s1451_s30, 3  ;;  %p1604_p8 = pnand %p1121_p4, %p48_p12 }
  0x22   : > { %s1860_s9 = scalar_select %p1593_p5, 1, 0 }
  0x23   : > { %s317_s15 = sand.u32 1, %s1451_s30   ;;  %s1863_s1 = sld [smem:[#allocation24_spill]] }
  0x24   : > { %1861 = sst [smem:[#allocation23_spill]] %s1860_s9  ;;  %s321_s17 = scalar_lea.vmem [#allocation5], %s1599_s10 }
  0x25   : > { %s329_s18 = sshll.u32 %s321_s17, 4  ;;  %s279_s20 = sshll.u32 %s1835_s5, 4  ;;  %s330_s18 = int_to_ptr.vmem [resolvable:$true] %s329_s18  ;;  %s280_s20 = int_to_ptr.hbm [resolvable:$true] %s279_s20 }
  0x26   : > { %s1617_s9 = scalar_lea.sflag [#allocation6], %s317_s15  ;;  %p1229_p9 = pneg %p1604_p8 }
  0x29   : > { %s325_s22 = scalar_lea.hbm %s1863_s1, %s1602_s11  ;;  %s1232_s21 = scalar_lea.hbm %s1863_s1, 16 }
  0x2a   : > { %s327_s3 = sshll.u32 %s325_s22, 4  ;;  %s328_s3 = int_to_ptr.hbm [resolvable:$true] %s327_s3 }
  0x2b   : > { %s1225_s27 = sshra.s32 %s328_s3, 4  ;;  %s1226_s27 = int_to_ptr.hbm [resolvable:$true] %s1225_s27 }
  0x2c   : > { %s1227_s6 = scalar_lea.hbm %s1226_s27, 8  ;;  %p1233_p12 = scmp.lt.s32.totalorder %s1226_s27, %s1863_s1 }
  0x2d   : > { %p1228_p7 = scmp.ne.s32.totalorder %s1226_s27, %s1227_s6  ;;  %p1234_p2 = scmp.lt.s32.totalorder %s1232_s21, %s1227_s6 }
  0x2f   : > { %p1230_p10 = pnand %p1229_p9, %p1228_p7  ;;  %p1235_p4 = por %p1234_p2, %p1233_p12 }
  0x31   : > { %p1231_p11 = pneg %p1230_p10 }
  0x33   : > { %p1236_p1 = pnand %p1235_p4, %p1231_p11 }
  0x35   : > { %1239 = shalt.err (!%p1236_p1)
}
  0x36   : > { %1108 = dma.hbm_to_vmem [thread:$0]  (!%p1604_p8), %s328_s3, 128, %s330_s18, %s1617_s9  }
  0x37   : > { %s1456_s23 = smov [#allocation10]   ;;  %s1864_s30 = smov 8  }
  0x38   : > { %s281_s26 = sshll.u32 %s1456_s23, 4  ;;  %s1865_s27 = smov 128   ;;  %s282_s26 = int_to_ptr.vmem [resolvable:$true] %s281_s26 }
  0x39   : > { %1101 = dma.hbm_to_vmem [thread:$0]  (!%p1556_p6), %s280_s20, 512, %s282_s26, [#allocation9], %s1865_s27, %s1865_s27, %s1864_s30  }
  0x3a   : > { %s306_s17 = scalar_lea.hbm %s1830_s0, %s1602_s11  ;;  %s302_s19 = scalar_lea.vmem [#allocation2], %s1599_s10 }
  0x3b   : > { %s310_s21 = sshll.u32 %s302_s19, 4  ;;  %s308_s22 = sshll.u32 %s306_s17, 4  ;;  %s311_s21 = int_to_ptr.vmem [resolvable:$true] %s310_s21  ;;  %s309_s22 = int_to_ptr.hbm [resolvable:$true] %s308_s22 }
  0x3c   : > { %s1866_s3 = sand.u32 1, %s1447_s29   ;;  %s1285_s1 = sshra.s32 %s309_s22, 4  ;;  %s1286_s1 = int_to_ptr.hbm [resolvable:$true] %s1285_s1 }
  0x3d   : > { %s299_s18 = scalar_lea.sflag [#allocation3], %s1866_s3  ;;  %s1287_s23 = scalar_lea.hbm %s1286_s1, 8 }
  0x3e   : > { %p1288_p1 = scmp.ne.s32.totalorder %s1286_s1, %s1287_s23  ;;  %s1292_s26 = scalar_lea.hbm %s1830_s0, 16 }
  0x3f   : > { %p1293_p6 = scmp.lt.s32.totalorder %s1286_s1, %s1830_s0  ;;  %p1294_p11 = scmp.lt.s32.totalorder %s1292_s26, %s1287_s23 }
  0x40   : > { %p1290_p7 = pnand %p1288_p1, %p1229_p9 }
  0x41   : > { %p1295_p12 = por %p1294_p11, %p1293_p6 }
  0x42   : > { %p1291_p10 = pneg %p1290_p7 }
  0x44   : > { %p1296_p2 = pnand %p1295_p12, %p1291_p10 }
  0x46   : > { %1299 = shalt.err (!%p1296_p2)
}
  0x47   : > { %1105 = dma.hbm_to_vmem [thread:$0]  (!%p1604_p8), %s309_s22, 128, %s311_s21, %s299_s18  }
  0x48   : > { %s344_s17 = scalar_lea.hbm %s1832_s2, %s1602_s11  ;;  %s340_s19 = scalar_lea.vmem [#allocation7], %s1599_s10 }
  0x49   : > { %s348_s3 = sshll.u32 %s340_s19, 4  ;;  %s346_s16 = sshll.u32 %s344_s17, 4  ;;  %s349_s3 = int_to_ptr.vmem [resolvable:$true] %s348_s3  ;;  %s347_s16 = int_to_ptr.hbm [resolvable:$true] %s346_s16 }
  0x4a   : > { %s1315_s1 = sshra.s32 %s347_s16, 4  ;;  %s1322_s21 = scalar_lea.hbm %s1832_s2, 16  ;;  %s1316_s1 = int_to_ptr.hbm [resolvable:$true] %s1315_s1 }
  0x4b   : > { %s1317_s23 = scalar_lea.hbm %s1316_s1, 8  ;;  %p1323_p10 = scmp.lt.s32.totalorder %s1316_s1, %s1832_s2 }
  0x4c   : > { %p1318_p4 = scmp.ne.s32.totalorder %s1316_s1, %s1317_s23  ;;  %p1324_p6 = scmp.lt.s32.totalorder %s1322_s21, %s1317_s23 }
  0x4e   : > { %p1320_p1 = pnand %p1318_p4, %p1229_p9  ;;  %p1325_p11 = por %p1324_p6, %p1323_p10 }
  0x50   : > { %p1321_p7 = pneg %p1320_p1 }
  0x52   : > { %p1326_p12 = pnand %p1325_p11, %p1321_p7 }
  0x54   : > { %1329 = shalt.err (!%p1326_p12)
}
  0x55   : > { %1111 = dma.hbm_to_vmem [thread:$0]  (!%p1604_p8), %s347_s16, 128, %s349_s3, %s1617_s9  }
  0x56   : > { %357 = sbr.rel (%p1547_p3) target bundleno = 1643 (0x66b), region = 48  ;;  %s1676_s10 = sand.u32 (!%p1547_p3), 1, %s1443_s28  }
  0x57   : > { %s1679_s11 = sshll.u32 (!%p1547_p3), %s1676_s10, 3  ;;  %s360_s30 = scalar_lea.sflag (!%p1547_p3), [#allocation3], %s1676_s10 }
  0x58   : > { %s363_s27 = scalar_lea.vmem (!%p1547_p3), [#allocation2], %s1679_s11 }
  0x5b   : > { %1418 = dma.done.wait (%p1583_p13), %s360_s30, 128  }
  0x5c   : > { %1420 = vsyncadd (%p1583_p13), %s360_s30, 4294967168  ;;  %s369_s13 = sand.u32 1, %s1542_s12   ;;  %s373_s14 = scalar_lea.vmem [#allocation5], %s1679_s11 }
  0x5d   : > { %s370_s9 = scalar_lea.sflag [#allocation6], %s369_s13 }
  0x5e   : > { %1422 = dma.done.wait (%p1583_p13), %s370_s9, 256  }
  0x5f   : > { %1424 = vsyncadd (%p1583_p13), %s370_s9, 4294967040  ;;  %s383_s6 = scalar_lea.vmem [#allocation7], %s1679_s11  ;;  %p1867_p3 = scmp.eq.s32.totalorder %s1542_s12, 0 }
  0x61   : > { %1426 = dma.done.wait (%p1867_p3), [#allocation9], 2048   ;;  %p1868_p8 = pmov %p1867_p3 }
  0x62   : > { %v443_v0 = vld [vmem:[%s373_s14] sm:$0xff]  ;;  %v468_v1 = vld [vmem:[#allocation8 + $0x58] sm:$0xff]  ;;  %s1457_s15 = smov 32   ;;  %v467_v2 = vld [vmem:[#allocation8 + $0x50] sm:$0xff]  ;;  %s1458_s24 = smov 64   ;;  %vm453_vm0 = vcmask 261120   ;;  %v497_v26 = vlaneseq }
  0x63   : > { %1428 = vsyncadd (%p1868_p8), [#allocation9], 4294965248  ;;  %446 = vrot.lane.b32.xlu0 %v443_v0, %s1457_s15  ;;  %481 = vmatpush.msra.mxu0 %v468_v1  ;;  %v466_v3 = vld [vmem:[#allocation8 + $0x48] sm:$0xff]  ;;  %v465_v4 = vld [vmem:[#allocation8 + $0x40] sm:$0xff]  ;;  %vm455_vm1 = vcmask 523264   ;;  %vm473_vm2 = vcmask 785408  }
  0x64   : > { %v444_v5 = vld [vmem:[%s383_s6] sm:$0xff]  ;;  %v462_v8 = vld [vmem:[#allocation8 + $0x28] sm:$0xff]  ;;  %v461_v9 = vld [vmem:[#allocation8 + $0x20] sm:$0xff]  ;;  %s1459_s3 = smov 120   ;;  %s1460_s16 = smov 96   ;;  %vm505_vm3 = vcmask 64512  }
  0x65   : > { %482 = vmatpush.msra.mxu0 %v467_v2  ;;  %v464_v6 = vld [vmem:[#allocation8 + $0x38] sm:$0xff]  ;;  %v463_v7 = vld [vmem:[#allocation8 + $0x30] sm:$0xff]  ;;  %v458_v12 = vld [vmem:[#allocation8 + $0x8] sm:$0xff]  ;;  %s1461_s1 = smov 88   ;;  %s1462_s23 = smov 80   ;;  %v1717_v27 = vshrl.u32 %v497_v26, 7 }
  0x66   : > { %v460_v10 = vld [vmem:[#allocation8 + $0x18] sm:$0xff]  ;;  %v459_v11 = vld [vmem:[#allocation8 + $0x10] sm:$0xff]  ;;  %v457_v13 = vld [vmem:[#allocation8] sm:$0xff]  ;;  %v1719_v28 = vand.u32 127, %v497_v26  ;;  %s1463_s20 = smov 56   ;;  %s1464_s26 = smov 72  }
  0x67   : > { %483 = vmatpush.msra.mxu0 %v466_v3  ;;  %v442_v15 = vld [vmem:[%s363_s27] sm:$0xff]  ;;  %s1465_s21 = smov 104   ;;  %s1466_s22 = smov 112   ;;  %vm794_vm13 = vcmask 130048   ;;  %vm796_vm14 = vcmask 195584  }
  0x68   : > { %v1177_v19 = vld [vmem:[%s1834_s4] ss:$0 sm:$0xff]  ;;  %vm501_vm4 = vcmp.le.s32.totalorder %v1719_v28, %v1717_v27  ;;  %s1050_s18 = sshll.u32 %s1676_s10, 5  ;;  %s1467_s27 = smov 48  }
  0x69   : > { %484 = vmatpush.msra.mxu0 %v465_v4  ;;  %s1740_s30 = scalar_lea.vmem [#allocation11], %s1050_s18  ;;  %s1468_s13 = smov 40  }
  0x6a   : > { %s1469_s9 = smov 8   ;;  %s1470_s14 = smov 16  }
  0x6b   : > { %450 = vrot.lane.b32.xlu0 %v444_v5, %s1458_s24  ;;  %485 = vmatpush.msra.mxu0 %v464_v6  ;;  %s1471_s6 = smov 24   ;;  %s848_s15 = sshll.u32 %s1740_s30, 4  ;;  %s849_s15 = int_to_ptr.vmem [resolvable:$true] %s848_s15 }
  0x6d   : > { %486 = vmatpush.msra.mxu0 %v463_v7 }
  0x6f   : > { %487 = vmatpush.msra.mxu0 %v462_v8 }
  0x71   : > { %488 = vmatpush.msra.mxu0 %v461_v9 }
  0x73   : > { %489 = vmatpush.msra.mxu0 %v460_v10 }
  0x75   : > { %490 = vmatpush.msra.mxu0 %v459_v11 }
  0x77   : > { %491 = vmatpush.msra.mxu0 %v458_v12 }
  0x79   : > { %492 = vmatpush.msra.mxu0 %v457_v13 }
  0xd5   : > { %v447_v14 = vpop.permute.xlu0 %446 }
  0xd6   : > { %v454_v16 = vsel %vm453_vm0, %v442_v15, %v447_v14 }
  0xdd   : > { %v451_v17 = vpop.permute.xlu0 %450 }
  0xde   : > { %v456_v18 = vsel %vm455_vm1, %v454_v16, %v451_v17 }
  0xdf   : > { %1052 = vmatmul.msk.f32.vlgmr.msra.gmra.mxu0 %vm473_vm2, %v456_v18 }
 0x15c   : > { %v494_v20 = vpop.f32.mrf.mxu0 }
 0x15d   : > { %v1705_v21 = vadd.f32 %v1177_v19, %v494_v20  ;;  %v801_v20 = vld [vmem:[#allocation10 + $0x18] sm:$0xff] }
 0x15f   : > { %571 = vrot.lane.b32.xlu2 %v1705_v21, %s1459_s3  ;;  %503 = vrot.lane.b32.xlu1 %v1705_v21, %s1460_s16 }
 0x167   : > { %573 = vrot.lane.b32.xlu1 %v1705_v21, %s1461_s1  ;;  %s831_s1 = scalar_lea.sflag [#allocation4], %s1676_s10 }
 0x16f   : > { %643 = vrot.lane.b32.xlu1 %v1705_v21, %s1462_s23 }
 0x1b9   : > { %v572_v24 = vpop.permute.xlu2 %571 }
 0x1d1   : > { %v504_v22 = vpop.permute.xlu1 %503 }
 0x1d2   : > { %1053 = vmatpush.xpose.msk.msra.mxu1 %vm505_vm3, %v504_v22  ;;  %v799_v22 = vld [vmem:[#allocation10 + $0x8] sm:$0xff] }
 0x1d5   : > { %1054 = vmatmul.msk.f32.vlgmr.msra.gmra.mxu1 %vm505_vm3, %v1705_v21 }
 0x1d9   : > { %v574_v23 = vpop.permute.xlu1 %573 }
 0x1da   : > { %1056 = vmatpush.xpose.msk.msra.mxu3 %vm505_vm3, %v574_v23  ;;  %v798_v23 = vld [vmem:[#allocation10] sm:$0xff] }
 0x1dd   : > { %1057 = vmatmul.msk.f32.vlgmr.msra.gmra.mxu3 %vm505_vm3, %v572_v24 }
 0x1e1   : > { %v644_v25 = vpop.permute.xlu1 %643 }
 0x1e2   : > { %1060 = vmatpush.xpose.msk.msrb.mxu1 %vm505_vm3, %v644_v25 }
 0x252   : > { %v527_v29 = vpop.f32.mrf.mxu1 }
 0x253   : > { %vm530_vm5 = vcmp.ne.f32.partialorder %v527_v29, 0.0 }
 0x254   : > { %vm531_vm6 = vmand %vm501_vm4, %vm530_vm5 }
 0x255   : > { %v532_v30 = vsel %vm531_vm6, %v527_v29, -inf }
 0x256   : > { %v533_v31 = vsel %vm505_vm3, %v532_v30, -inf }
 0x257   : > { %534 = vmax.xlane.f32.xlu2 %v533_v31 }
 0x260   : > { %v596_v32 = vpop.f32.mrf.mxu3 }
 0x261   : > { %vm599_vm7 = vcmp.ne.f32.partialorder %v596_v32, 0.0 }
 0x262   : > { %vm600_vm8 = vmand %vm501_vm4, %vm599_vm7 }
 0x263   : > { %v601_v33 = vsel %vm600_vm8, %v596_v32, -inf }
 0x264   : > { %v602_v34 = vsel %vm505_vm3, %v601_v33, -inf }
 0x265   : > { %603 = vmax.xlane.f32.xlu0 %v602_v34 }
 0x26f   : > { %545 = vrot.lane.b32.xlu2 %v1705_v21, %s1458_s24  ;;  %s1076_s24 = sshll.u32 %s1542_s12, 5 }
 0x270   : > { %s847_s3 = scalar_lea.hbm %s1837_s7, %s1076_s24 }
 0x271   : > { %s850_s16 = sshll.u32 %s847_s3, 4  ;;  %s851_s16 = int_to_ptr.hbm [resolvable:$true] %s850_s16 }
 0x272   : > { %s1359_s23 = sshra.s32 %s851_s16, 4  ;;  %s1360_s23 = int_to_ptr.hbm [resolvable:$true] %s1359_s23 }
 0x273   : > { %p1366_p4 = scmp.lt.s32.totalorder %s1360_s23, %s1837_s7 }
 0x279   : > { %615 = vrot.lane.b32.xlu0 %v1705_v21, %s1463_s20  ;;  %s1361_s20 = scalar_lea.hbm %s1360_s23, 32 }
 0x27a   : > { %p1362_p13 = scmp.ne.s32.totalorder %s1360_s23, %s1361_s20 }
 0x27c   : > { %p1363_p9 = pnand %p1362_p13, %p1587_p0 }
 0x27e   : > { %p1364_p2 = pneg %p1363_p9 }
 0x281   : > { %713 = vrot.lane.b32.xlu0 %v1705_v21, %s1464_s26 }
 0x2ca   : > { %v535_v35 = vpop.xlane.xlu2 %534 }
 0x2cb   : > { %v536_v36 = vsub.f32 %v532_v30, %v535_v35 }
 0x2cd   : > { %v537_v37 = vmul.f32 1.442695, %v536_v36 }
 0x2cf   : > { %1179 = vpow2.f32 %v537_v37 }
 0x2d2   : > { %v546_v38 = vpop.permute.xlu2 %545 }
 0x2d3   : > { %566 = vmatpush.msra.mxu2 %v546_v38 }
 0x2d5   : > { %v1180_v39 = vpop.eup %1179 }
 0x2d6   : > { %v539_v40 = vsel %vm505_vm3, %v1180_v39, 0.0 }
 0x2d7   : > { %540 = vadd.xlane.f32.xlu1 %v539_v40 }
 0x2d8   : > { %v604_v41 = vpop.xlane.xlu0 %603 }
 0x2d9   : > { %v605_v42 = vsub.f32 %v601_v33, %v604_v41 }
 0x2db   : > { %v606_v43 = vmul.f32 1.442695, %v605_v42 }
 0x2dd   : > { %1181 = vpow2.f32 %v606_v43 }
 0x2e3   : > { %v1182_v44 = vpop.eup %1181 }
 0x2e4   : > { %v608_v45 = vsel %vm505_vm3, %v1182_v44, 0.0 }
 0x2e5   : > { %609 = vadd.xlane.f32.xlu2 %v608_v45 }
 0x2eb   : > { %v616_v46 = vpop.permute.xlu0 %615 }
 0x2ec   : > { %636 = vmatpush.msrb.mxu2 %v616_v46 }
 0x2f0   : > { %711 = vrot.lane.b32.xlu1 %v1705_v21, %s1465_s21 }
 0x2f3   : > { %v714_v50 = vpop.permute.xlu0 %713 }
 0x2fd   : > { %641 = vrot.lane.b32.xlu2 %v1705_v21, %s1466_s22  ;;  %s1365_s22 = scalar_lea.hbm %s1837_s7, 64 }
 0x2fe   : > { %p1367_p1 = scmp.lt.s32.totalorder %s1365_s22, %s1361_s20 }
 0x300   : > { %p1368_p7 = por %p1367_p1, %p1366_p4 }
 0x302   : > { %p1369_p10 = pnand %p1368_p7, %p1364_p2 }
 0x34a   : > { %v541_v47 = vpop.xlane.xlu1 %540 }
 0x34b   : > { %1183 = vrcp.f32 %v541_v47 }
 0x351   : > { %v1184_v48 = vpop.eup %1183 }
 0x352   : > { %v543_v49 = vmul.f32 %v1184_v48, %v1180_v39 }
 0x354   : > { %544 = vst.msk [vmem:[%s1740_s30] sm:$0xff] %vm505_vm3, %v543_v49  ;;  %1055 = vmatmul.msk.f32.vlgmr.msra.gmra.mxu2 %vm505_vm3, %v543_v49 }
 0x355   : > { %1064 = vmatpush.xpose.msk.msra.mxu2 %vm505_vm3, %v714_v50 }
 0x358   : > { %v610_v51 = vpop.xlane.xlu2 %609 }
 0x359   : > { %1185 = vrcp.f32 %v610_v51 }
 0x35f   : > { %v1186_v52 = vpop.eup %1185 }
 0x360   : > { %v642_v53 = vpop.permute.xlu2 %641  ;;  %v612_v54 = vmul.f32 %v1186_v52, %v1182_v44 }
 0x361   : > { %1061 = vmatmul.msk.f32.vlgmr.msrb.gmra.mxu1 %vm505_vm3, %v642_v53 }
 0x362   : > { %1058 = vst.msk [vmem:[%s1740_s30 + $0x8] sm:$0xff] %vm505_vm3, %v612_v54  ;;  %1059 = vmatmul.msk.f32.vlgmr.msrb.gmra.mxu2 %vm505_vm3, %v612_v54  ;;  %v712_v55 = vpop.permute.xlu1 %711 }
 0x36a   : > { %1065 = vmatmul.msk.f32.vlgmr.msra.gmra.mxu2 %vm505_vm3, %v712_v55 }
 0x3d7   : > { %v1751_v56 = vpop.f32.mrf.mxu2 }
 0x3de   : > { %v666_v57 = vpop.f32.mrf.mxu1 }
 0x3df   : > { %vm669_vm9 = vcmp.ne.f32.partialorder %v666_v57, 0.0 }
 0x3e0   : > { %vm670_vm10 = vmand %vm501_vm4, %vm669_vm9 }
 0x3e1   : > { %v671_v58 = vsel %vm670_vm10, %v666_v57, -inf }
 0x3e2   : > { %v672_v59 = vsel %vm505_vm3, %v671_v58, -inf }
 0x3e3   : > { %673 = vmax.xlane.f32.xlu0 %v672_v59 }
 0x3e5   : > { %v638_v60 = vpop.f32.mrf.mxu2 }
 0x3ed   : > { %v736_v61 = vpop.f32.mrf.mxu2 }
 0x3ee   : > { %vm739_vm11 = vcmp.ne.f32.partialorder %v736_v61, 0.0 }
 0x3ef   : > { %vm740_vm12 = vmand %vm501_vm4, %vm739_vm11 }
 0x3f0   : > { %v741_v62 = vsel %vm740_vm12, %v736_v61, -inf }
 0x3f1   : > { %v742_v63 = vsel %vm505_vm3, %v741_v62, -inf }
 0x3f2   : > { %743 = vmax.xlane.f32.xlu2 %v742_v63 }
 0x40a   : > { %685 = vrot.lane.b32.xlu2 %v1705_v21, %s1467_s27 }
 0x456   : > { %v674_v0 = vpop.xlane.xlu0 %673 }
 0x457   : > { %v675_v1 = vsub.f32 %v671_v58, %v674_v0 }
 0x459   : > { %v676_v2 = vmul.f32 1.442695, %v675_v1 }
 0x45b   : > { %1187 = vpow2.f32 %v676_v2 }
 0x461   : > { %v1188_v3 = vpop.eup %1187 }
 0x462   : > { %v678_v4 = vsel %vm505_vm3, %v1188_v3, 0.0 }
 0x463   : > { %679 = vadd.xlane.f32.xlu1 %v678_v4 }
 0x465   : > { %v744_v5 = vpop.xlane.xlu2 %743 }
 0x466   : > { %v745_v6 = vsub.f32 %v741_v62, %v744_v5 }
 0x468   : > { %v746_v7 = vmul.f32 1.442695, %v745_v6 }
 0x46a   : > { %1189 = vpow2.f32 %v746_v7 }
 0x46d   : > { %v686_v8 = vpop.permute.xlu2 %685 }
 0x46e   : > { %706 = vmatpush.msrb.mxu3 %v686_v8 }
 0x470   : > { %v1190_v9 = vpop.eup %1189  ;;  %821 = vmatpush.msra.mxu3 %v801_v20 }
 0x471   : > { %v748_v10 = vsel %vm505_vm3, %v1190_v9, 0.0 }
 0x472   : > { %749 = vadd.xlane.f32.xlu0 %v748_v10 }
 0x47c   : > { %755 = vrot.lane.b32.xlu1 %v1705_v21, %s1468_s13  ;;  %v800_v21 = vld [vmem:[#allocation10 + $0x10] sm:$0xff] }
 0x47d   : > { %822 = vmatpush.msra.mxu3 %v800_v21 }
 0x47f   : > { %823 = vmatpush.msra.mxu3 %v799_v22 }
 0x481   : > { %824 = vmatpush.msra.mxu3 %v798_v23 }
 0x486   : > { %782 = vrot.lane.b32.xlu0 %v638_v60, %s1469_s9 }
 0x4d6   : > { %v680_v11 = vpop.xlane.xlu1 %679 }
 0x4d7   : > { %1191 = vrcp.f32 %v680_v11 }
 0x4dd   : > { %v1192_v12 = vpop.eup %1191 }
 0x4de   : > { %v682_v13 = vmul.f32 %v1192_v12, %v1188_v3 }
 0x4e0   : > { %1062 = vst.msk [vmem:[%s1740_s30 + $0x10] sm:$0xff] %vm505_vm3, %v682_v13  ;;  %1063 = vmatmul.msk.f32.vlgmr.msrb.gmra.mxu3 %vm505_vm3, %v682_v13 }
 0x4e5   : > { %v750_v14 = vpop.xlane.xlu0 %749 }
 0x4e6   : > { %1193 = vrcp.f32 %v750_v14 }
 0x4ec   : > { %v1194_v15 = vpop.eup %1193 }
 0x4ed   : > { %v752_v16 = vmul.f32 %v1194_v15, %v1190_v9 }
 0x4ee   : > { %v756_v17 = vpop.permute.xlu1 %755 }
 0x4ef   : > { %1066 = vst.msk [vmem:[%s1740_s30 + $0x18] sm:$0xff] %vm505_vm3, %v752_v16  ;;  %776 = vmatpush.msra.mxu1 %v756_v17 }
 0x4f0   : > { %1067 = vmatmul.msk.f32.vlgmr.msra.gmra.mxu1 %vm505_vm3, %v752_v16 }
 0x4f8   : > { %v783_v24 = vpop.permute.xlu0 %782 }
 0x4f9   : > { %v793_v26 = vsel %vm505_vm3, %v1751_v56, %v783_v24 }
 0x563   : > { %v708_v18 = vpop.f32.mrf.mxu3 }
 0x564   : > { %786 = vrot.lane.b32.xlu2 %v708_v18, %s1470_s14 }
 0x56d   : > { %v778_v19 = vpop.f32.mrf.mxu1 }
 0x56e   : > { %790 = vrot.lane.b32.xlu0 %v778_v19, %s1471_s6 }
 0x5be   : > { %v787_v25 = vpop.permute.xlu2 %786 }
 0x5bf   : > { %v795_v27 = vsel %vm794_vm13, %v793_v26, %v787_v25 }
 0x5e0   : > { %v791_v28 = vpop.permute.xlu0 %790 }
 0x5e1   : > { %v797_v29 = vsel %vm796_vm14, %v795_v27, %v791_v28 }
 0x5e2   : > { %1068 = vmatmul.msk.f32.vlgmr.msra.gmra.mxu3 %vm453_vm0, %v797_v29 }
 0x5e3   : > { %1372 = shalt.err (!%p1369_p10)
}
 0x5e4   : > { %s1472_s27 = smov 128   ;;  %s1073_s13 = sshll.u32 %s1542_s12, 3 }
 0x5e5   : > { %1091 = dma.vmem_to_hbm [thread:$0]  (%p1587_p0), %s849_s15, 512, %s851_s16, %s831_s1, %s1472_s27, %s1472_s27, %s1469_s9  }
 0x5e6   : > { %s863_s24 = scalar_lea.hbm %s1838_s8, %s1073_s13  ;;  %s1869_s3 = sld [smem:[#allocation26_spill]] }
 0x5e7   : > { %s441_s23 = scalar_lea.vmem [#allocation12], %s1679_s11  ;;  %s867_s26 = sshll.u32 %s863_s24, 4  ;;  %s868_s26 = int_to_ptr.hbm [resolvable:$true] %s867_s26 }
 0x5e8   : > { %s865_s20 = sshll.u32 %s441_s23, 4  ;;  %s836_s9 = scalar_lea.sflag [#allocation13], %s1676_s10  ;;  %s866_s20 = int_to_ptr.vmem [resolvable:$true] %s865_s20 }
 0x5e9   : > { %s1387_s12 = sshra.s32 %s868_s26, 4  ;;  %s1393_s11 = scalar_lea.hbm %s1838_s8, 16  ;;  %s1388_s12 = int_to_ptr.hbm [resolvable:$true] %s1387_s12 }
 0x5ea   : > { %s1389_s15 = scalar_lea.hbm %s1388_s12, 8  ;;  %p1394_p3 = scmp.lt.s32.totalorder %s1388_s12, %s1838_s8 }
 0x5eb   : > { %p1390_p6 = scmp.ne.s32.totalorder %s1388_s12, %s1389_s15  ;;  %p1395_p8 = scmp.lt.s32.totalorder %s1393_s11, %s1389_s15 }
 0x5ec   : > { %v1178_v30 = vld [vmem:[%s1869_s3] ss:$0 sm:$0xff] }
 0x5ed   : > { %p1391_p11 = pnand %p1390_p6, %p1587_p0  ;;  %p1396_p13 = por %p1395_p8, %p1394_p3 }
 0x5ef   : > { %p1392_p12 = pneg %p1391_p11 }
 0x5f1   : > { %p1397_p9 = pnand %p1396_p13, %p1392_p12 }
 0x665   : > { %v826_v31 = vpop.f32.mrf.mxu3 }
 0x666   : > { %v827_v32 = vadd.f32 %v1178_v30, %v826_v31 }
 0x668   : > { %829 = vst.msk [vmem:[%s441_s23] sm:$0xff] %vm453_vm0, %v827_v32 }
 0x669   : > { %1400 = shalt.err (!%p1397_p9)
}
 0x66a   : > { %1092 = dma.vmem_to_hbm [thread:$0]  (%p1587_p0), %s866_s20, 128, %s868_s26, %s836_s9  }
 0x66b PF: > { %s1870_s10 = sld [smem:[#allocation19_spill]] }
 0x66c   : > { %s1872_s30 = sld [smem:[#allocation20_spill]] }
 0x671   : > { %s879_s27 = sand.u32 1, %s1870_s10  }
 0x672   : > { %p1873_p2 = scmp.ge.s32.totalorder %s1872_s30, 2  ;;  %s880_s13 = scalar_lea.sflag [#allocation4], %s879_s27 }
 0x674   : > { %p1113_p4 = pnand %p1873_p2, %p1593_p5 }
 0x676   : > { %p1114_p1 = pneg %p1113_p4 }
 0x678   : > { %1430 = dma.done.wait (%p1114_p1), %s880_s13, 512  }
 0x679   : > { %1432 = vsyncadd (%p1114_p1), %s880_s13, 4294966784  ;;  %s890_s14 = scalar_lea.sflag [#allocation13], %s879_s27 }
 0x67a   : > { %1434 = dma.done.wait (%p1114_p1), %s890_s14, 128  }
 0x67b   : > { %1436 = vsyncadd (%p1114_p1), %s890_s14, 4294967168  ;;  %s1874_s30 = sld [smem:[#allocation21_spill]]  ;;  %s1876_s27 = smov %s1443_s28 }
 0x67c   : > { %s1875_s25 = sld [smem:[#allocation22_spill]]  ;;  %s1877_s28 = smov %s1447_s29 }
 0x681   : > { %p29_p0 = scmp.ge.s32.totalorder %s1874_s30, 4  }
 0x682   : > { %s1878_s29 = smov %s1875_s25 }
 0x683   :  { %31 = sbr.rel (!%p29_p0) target bundleno = 14 (0xe), region = 145 }
 0x688   :  { %896 = vsyncpa [#allocation3], 1 }
 0x689   :  { %898 = vsyncpa [#allocation3 + $0x1], 1 }
 0x68a   :  { %899 = vsyncpa [#allocation6], 1 }
 0x68b   :  { %901 = vsyncpa [#allocation6 + $0x1], 1 }
 0x68c   :  { %902 = vsyncpa [#allocation9], 1 }
 0x68d   :  { %903 = vsyncpa [#allocation4], 1 }
 0x68e   :  { %905 = vsyncpa [#allocation4 + $0x1], 1 }
 0x68f   :  { %906 = vsyncpa [#allocation13], 1 }
 0x690   :  { %908 = vsyncpa [#allocation13 + $0x1], 1 }

</bundles_post_ra>
